<compile_context>
chip_gen: v7x
topology: tpu7x:2x2x1
jax: 0.10.0
libtpu: 0.0.40
codegen_flags: <defaults>
</compile_context>

<pallas_src>
import jax
import jax.numpy as jnp
from jax import lax
from jax.experimental import pallas as pl
from jax.experimental.pallas import tpu as pltpu

_LANE = 128
_SUBLANE = 8


def _round_up(x, m):
    return ((x + m - 1) // m) * m


# ---------------------------------------------------------------------------
# Gabor wavelet filterbank (parameter preprocessing, plain JAX -- tiny (F, L)).
# ---------------------------------------------------------------------------
def gabor_wavelets(tt, foi, fwhm, sfreq, scaling="oct",
                   min_foi_oct=-2.0, max_foi_oct=6.0,
                   min_fwhm_oct=-6.0, max_fwhm_oct=1.0):
    """Returns (w_real, w_imag), each (F, L) float32, matching _compute_gaborwavelet."""
    tt = tt.astype(jnp.float32)
    foi_oct = 2.0 ** jnp.clip(foi.astype(jnp.float32), min_foi_oct, max_foi_oct)
    fwhm_oct = 2.0 ** jnp.clip(fwhm.astype(jnp.float32), min_fwhm_oct, max_fwhm_oct)
    phase = 2.0 * jnp.pi * foi_oct[:, None] * tt[None, :]
    env = jnp.exp(-4.0 * jnp.log(2.0) * (tt[None, :] ** 2) / (fwhm_oct[:, None] ** 2))
    wr = jnp.cos(phase) * env
    wi = jnp.sin(phase) * env
    norm = jnp.sqrt(jnp.sum(wr * wr + wi * wi, axis=-1, keepdims=True))
    wr = wr / norm
    wi = wi / norm
    if scaling == "oct":
        scale = jnp.sqrt(2.0 / sfreq) * jnp.sqrt(jnp.log(2.0) * foi_oct)[:, None]
        wr = wr * scale
        wi = wi * scale
    return wr, wi


# ---------------------------------------------------------------------------
# Pallas kernel: in-kernel windowing + one MXU matmul per (signal, time-chunk).
# ---------------------------------------------------------------------------
def _make_conv_kernel(L, s_blk, t_pad, t_chunk):
    n_chunks = t_pad // t_chunk
    win_len = t_chunk + L - 1

    def kernel(w_ref, x_ref, o_ref, col_ref):
        # w_ref:   (2F_pad, L)            stacked [real; imag; zero-pad] taps (resident)
        # x_ref:   (S_blk, T_in_pad)      zero-padded raw signal rows for this block
        # o_ref:   (2F_pad, S_blk*T_pad)  conv outputs, one T_pad slab per signal
        # col_ref: (L, T_chunk)           windowed-operand scratch
        w = w_ref[...]

        def sig_body(s, carry):
            def chunk_body(c, carry2):
                t0 = pl.multiple_of(c * t_chunk, _LANE)
                # One (aligned-start) row read per chunk; taps are static value slices.
                win = x_ref[pl.ds(s, 1), pl.ds(t0, win_len)]          # (1, T_chunk+L-1)
                for l in range(L):                                    # static tap unroll
                    col_ref[pl.ds(l, 1), :] = win[:, l:l + t_chunk]
                res = jnp.dot(w, col_ref[...],
                              preferred_element_type=jnp.float32)     # (2F_pad, T_chunk)
                off = pl.multiple_of(s * t_pad + t0, _LANE)
                o_ref[:, pl.ds(off, t_chunk)] = res                   # lane-dense, aligned
                return carry2

            return lax.fori_loop(0, n_chunks, chunk_body, carry)

        lax.fori_loop(0, s_blk, sig_body, 0)

    return kernel


def _pick_s_blk(ce, b, per_sig_bytes, target_bytes=4 << 20, min_steps=8):
    """Largest divisor of CE whose block fits the VMEM budget and keeps >= min_steps grid steps."""
    best = 1
    total = b * ce
    need_steps = min(min_steps, total)
    for d in range(1, ce + 1):
        if ce % d:
            continue
        if d * per_sig_bytes <= target_bytes and (total // d) >= need_steps:
            best = d
    return best


# ---------------------------------------------------------------------------
# WaveletConv.forward
# ---------------------------------------------------------------------------
def wavelet_conv_forward(x, tt, foi, fwhm, *, sfreq, padding=0, stride=1,
                         scaling="oct"):
    """Forward pass of WaveletConv.

    x: (B, C, T) or (B, E, C, T) real array.
    Returns complex64:
      3-D input -> (B, F, C, T_out)
      4-D input -> (B, F, C, E * T_out)
    """
    assert isinstance(padding, int) and isinstance(stride, int) and stride >= 1
    wr, wi = gabor_wavelets(tt, foi, fwhm, sfreq, scaling)
    n_freqs, L = wr.shape
    two_f = 2 * n_freqs
    two_f_pad = _round_up(two_f, _SUBLANE)
    w2 = jnp.concatenate(
        [wr, wi, jnp.zeros((two_f_pad - two_f, L), jnp.float32)], axis=0
    ).astype(jnp.float32)                                              # (2F_pad, L)

    if x.ndim == 3:
        B, C, T = x.shape
        E = 1
        xs = x.astype(jnp.float32)                                     # signal order (b, c)
    elif x.ndim == 4:
        B, E, C, T = x.shape
        # Input-side permute (cheap f32) so the kernel's output order is already
        # (b, c, e, t) -- no complex64-domain transpose in the tail.
        xs = jnp.transpose(x.astype(jnp.float32), (0, 2, 1, 3)).reshape(B, C * E, T)
    else:
        raise ValueError("x must be 3-D or 4-D")
    CE = C * E

    T_p = T + 2 * padding
    if T_p < L:
        raise ValueError(f"padded input length {T_p} < wavelet length {L}")
    t_out1 = T_p - L + 1                     # stride-1 output length (computed in-kernel)
    t_out = (T_p - L) // stride + 1          # final output length

    # Block sizing: lane-aligned time chunks, VMEM-budget- and grid-aware signal blocks.
    t_chunk = min(1024, _round_up(t_out1, _LANE))
    t_pad = _round_up(t_out1, t_chunk)
    t_in_pad = _round_up(t_pad + L - 1, _LANE)

    per_sig_bytes = 4 * (t_in_pad + two_f_pad * t_pad)
    s_blk = _pick_s_blk(CE, B, per_sig_bytes)
    n_ce_blk = CE // s_blk

    # conv zero-padding (left) + alignment padding (right): one pass over the small f32 input.
    xs = jnp.pad(xs, ((0, 0), (0, 0), (padding, t_in_pad - T - padding)))
    x4 = xs.reshape(B, n_ce_blk, s_blk, t_in_pad)                      # free reshape

    kernel = _make_conv_kernel(L, s_blk, t_pad, t_chunk)

    # VMEM limit from the actual footprint (double-buffered blocks + scratch + slack);
    # stays comfortably inside v7x's 64 MiB as well as v5e/v6e's 128 MiB.
    need = (2 * (two_f_pad * L * 4
                 + s_blk * t_in_pad * 4
                 + two_f_pad * s_blk * t_pad * 4)
            + L * t_chunk * 4 + (2 << 20))
    vmem_limit = int(min(max(need, 16 << 20), 64 << 20))

    out3 = pl.pallas_call(
        kernel,
        out_shape=jax.ShapeDtypeStruct((B, two_f_pad, CE * t_pad), jnp.float32),
        grid_spec=pltpu.PrefetchScalarGridSpec(
            num_scalar_prefetch=0,
            grid=(B, n_ce_blk),
            in_specs=[
                pl.BlockSpec((two_f_pad, L), lambda b, i: (0, 0)),               # weights
                pl.BlockSpec((None, None, s_blk, t_in_pad), lambda b, i: (b, i, 0, 0)),
            ],
            out_specs=pl.BlockSpec((None, two_f_pad, s_blk * t_pad),
                                   lambda b, i: (b, 0, i)),
            scratch_shapes=[pltpu.VMEM((L, t_chunk), jnp.float32)],
        ),
        compiler_params=pltpu.CompilerParams(
            dimension_semantics=("parallel", "parallel"),
            vmem_limit_bytes=vmem_limit,
        ),
    )(w2, x4)

    # Single fused wrapper pass on the output: plane split + time slice (+ stride
    # decimation) + complex assembly.  Reshapes around it are metadata-only.
    out5 = out3.reshape(B, two_f_pad, C, E, t_pad)
    real = out5[:, :n_freqs, :, :, 0:t_out1:stride]
    imag = out5[:, n_freqs:two_f, :, :, 0:t_out1:stride]
    out_c = lax.complex(real, imag)                                    # (B, F, C, E, T_out)
    if x.ndim == 3:
        return out_c.reshape(B, n_freqs, C, t_out)
    return out_c.reshape(B, n_freqs, C, E * t_out)


# ---------------------------------------------------------------------------
# Plain-JAX reference of the PyTorch forward (independent conv path).
# ---------------------------------------------------------------------------
def _reference_forward(x, tt, foi, fwhm, *, sfreq, padding=0, stride=1,
                       scaling="oct"):
    wr, wi = gabor_wavelets(tt, foi, fwhm, sfreq, scaling)
    n_freqs, L = wr.shape
    B, E, C, T = x.shape
    xi = x.astype(jnp.float32).reshape(B * E * C, 1, T)

    def conv(w):
        return jax.lax.conv_general_dilated(
            xi, w[:, None, :].astype(jnp.float32),
            window_strides=(stride,), padding=[(padding, padding)],
            dimension_numbers=("NCH", "OIH", "NCH"),
            precision=jax.lax.Precision.HIGHEST)

    o = jax.lax.complex(conv(wr), conv(wi))                            # (S, F, T_out)
    T_out = o.shape[-1]
    o = o.reshape(B, E, C, n_freqs, T_out).transpose(0, 3, 2, 1, 4)
    return o.reshape(B, n_freqs, C, E * T_out)


if __name__ == "__main__":
    key = jax.random.PRNGKey(0)

    # Module config: kernel_width_s = 0.5 s at sfreq = 32 Hz -> L = 16 taps, F = 4 wavelets.
    sfreq = 32.0
    kernel_width_s = 0.5
    L = int(kernel_width_s * sfreq)
    tmax = kernel_width_s / 2.0
    tt = jnp.linspace(-tmax, tmax, L)
    foi = jnp.array([0.0, 1.0, 2.0, 3.0], dtype=jnp.float32)           # centre freqs (octaves)
    fwhm = jnp.array([-1.0, -1.0, -1.5, -2.0], dtype=jnp.float32)

    # Input: (batch=2, epochs=2, channels=4, times=64) real signal.
    B, E, C, T = 2, 2, 4, 64
    x = jax.random.normal(key, (B, E, C, T), dtype=jnp.float32)

    out = wavelet_conv_forward(x, tt, foi, fwhm, sfreq=sfreq, padding=0, stride=1)
    out = jax.block_until_ready(out)

    T_out = T - L + 1
    assert out.shape == (B, 4, C, E * T_out), out.shape
    assert out.dtype == jnp.complex64, out.dtype

    ref = _reference_forward(x, tt, foi, fwhm, sfreq=sfreq, padding=0, stride=1)
    assert jnp.allclose(out, ref, atol=2e-3, rtol=2e-3), float(jnp.max(jnp.abs(out - ref)))

    print("KERNEL_OK")
</pallas_src>

<mosaic_0001>
module attributes {stable_mosaic.version = 11 : i64} {
  func.func @kernel(%arg0: i32, %arg1: i32, %arg2: memref<8x16xf32, #tpu.memory_space<vmem>>, %arg3: memref<1x1x2x256xf32, #tpu.memory_space<vmem>>, %arg4: memref<1x8x256xf32, #tpu.memory_space<vmem>>, %arg5: memref<16x128xf32, #tpu.memory_space<vmem>>) attributes {dimension_semantics = [#tpu.dimension_semantics<parallel>, #tpu.dimension_semantics<parallel>], iteration_bounds = array<i64: 2, 4>, scalar_prefetch = 0 : i64, scratch_operands = 1 : i64, tpu.core_type = #tpu.core_type<tc>, window_params = [{pipeline_mode = #tpu.pipeline_mode<synchronous>, transform_indices = @transform_0, window_bounds = array<i64: 8, 16>}, {transform_indices = @transform_1, window_bounds = array<i64: 1, 1, 2, 256>}, {transform_indices = @transform_2, window_bounds = array<i64: 1, 8, 256>}]} {
    %c0 = arith.constant 0 : index
    %c0_0 = arith.constant 0 : index
    %0 = vector.load %arg2[%c0, %c0_0] : memref<8x16xf32, #tpu.memory_space<vmem>>, vector<8x16xf32>
    %c0_i32 = arith.constant 0 : i32
    %c2_i32 = arith.constant 2 : i32
    %1 = arith.addi %c0_i32, %c2_i32 : i32
    %c1_i32 = arith.constant 1 : i32
    scf.for %arg6 = %c0_i32 to %1 step %c1_i32  : i32 {
      %c0_i32_2 = arith.constant 0 : i32
      %c128_i32 = arith.constant 128 : i32
      %2 = arith.muli %c0_i32_2, %c128_i32 : i32
      %3 = tpu.assume_multiple %2, 128 : i32
      %c0_3 = arith.constant 0 : index
      %c0_4 = arith.constant 0 : index
      %4 = arith.index_cast %arg6 : i32 to index
      %5 = arith.index_cast %3 : i32 to index
      %6 = vector.load %arg3[%c0_3, %c0_4, %4, %5] : memref<1x1x2x256xf32, #tpu.memory_space<vmem>>, vector<1x1x1x143xf32>
      %7 = vector.shape_cast %6 : vector<1x1x1x143xf32> to vector<1x143xf32>
      %8 = vector.extract_strided_slice %7 {offsets = [0, 0], sizes = [1, 128], strides = [1, 1]} : vector<1x143xf32> to vector<1x128xf32>
      %c0_5 = arith.constant 0 : index
      %c0_6 = arith.constant 0 : index
      %9 = vector.load %arg5[%c0_5, %c0_6] : memref<16x128xf32, #tpu.memory_space<vmem>>, vector<1x128xf32>
      tpu.vector_store %arg5[%c0_5, %c0_6], %8 {strides = array<i32>} : memref<16x128xf32, #tpu.memory_space<vmem>>, vector<1x128xf32>,
      %10 = vector.extract_strided_slice %7 {offsets = [0, 1], sizes = [1, 128], strides = [1, 1]} : vector<1x143xf32> to vector<1x128xf32>
      %c1 = arith.constant 1 : index
      %c0_7 = arith.constant 0 : index
      %11 = vector.load %arg5[%c1, %c0_7] : memref<16x128xf32, #tpu.memory_space<vmem>>, vector<1x128xf32>
      tpu.vector_store %arg5[%c1, %c0_7], %10 {strides = array<i32>} : memref<16x128xf32, #tpu.memory_space<vmem>>, vector<1x128xf32>,
      %12 = vector.extract_strided_slice %7 {offsets = [0, 2], sizes = [1, 128], strides = [1, 1]} : vector<1x143xf32> to vector<1x128xf32>
      %c2 = arith.constant 2 : index
      %c0_8 = arith.constant 0 : index
      %13 = vector.load %arg5[%c2, %c0_8] : memref<16x128xf32, #tpu.memory_space<vmem>>, vector<1x128xf32>
      tpu.vector_store %arg5[%c2, %c0_8], %12 {strides = array<i32>} : memref<16x128xf32, #tpu.memory_space<vmem>>, vector<1x128xf32>,
      %14 = vector.extract_strided_slice %7 {offsets = [0, 3], sizes = [1, 128], strides = [1, 1]} : vector<1x143xf32> to vector<1x128xf32>
      %c3 = arith.constant 3 : index
      %c0_9 = arith.constant 0 : index
      %15 = vector.load %arg5[%c3, %c0_9] : memref<16x128xf32, #tpu.memory_space<vmem>>, vector<1x128xf32>
      tpu.vector_store %arg5[%c3, %c0_9], %14 {strides = array<i32>} : memref<16x128xf32, #tpu.memory_space<vmem>>, vector<1x128xf32>,
      %16 = vector.extract_strided_slice %7 {offsets = [0, 4], sizes = [1, 128], strides = [1, 1]} : vector<1x143xf32> to vector<1x128xf32>
      %c4 = arith.constant 4 : index
      %c0_10 = arith.constant 0 : index
      %17 = vector.load %arg5[%c4, %c0_10] : memref<16x128xf32, #tpu.memory_space<vmem>>, vector<1x128xf32>
      tpu.vector_store %arg5[%c4, %c0_10], %16 {strides = array<i32>} : memref<16x128xf32, #tpu.memory_space<vmem>>, vector<1x128xf32>,
      %18 = vector.extract_strided_slice %7 {offsets = [0, 5], sizes = [1, 128], strides = [1, 1]} : vector<1x143xf32> to vector<1x128xf32>
      %c5 = arith.constant 5 : index
      %c0_11 = arith.constant 0 : index
      %19 = vector.load %arg5[%c5, %c0_11] : memref<16x128xf32, #tpu.memory_space<vmem>>, vector<1x128xf32>
      tpu.vector_store %arg5[%c5, %c0_11], %18 {strides = array<i32>} : memref<16x128xf32, #tpu.memory_space<vmem>>, vector<1x128xf32>,
      %20 = vector.extract_strided_slice %7 {offsets = [0, 6], sizes = [1, 128], strides = [1, 1]} : vector<1x143xf32> to vector<1x128xf32>
      %c6 = arith.constant 6 : index
      %c0_12 = arith.constant 0 : index
      %21 = vector.load %arg5[%c6, %c0_12] : memref<16x128xf32, #tpu.memory_space<vmem>>, vector<1x128xf32>
      tpu.vector_store %arg5[%c6, %c0_12], %20 {strides = array<i32>} : memref<16x128xf32, #tpu.memory_space<vmem>>, vector<1x128xf32>,
      %22 = vector.extract_strided_slice %7 {offsets = [0, 7], sizes = [1, 128], strides = [1, 1]} : vector<1x143xf32> to vector<1x128xf32>
      %c7 = arith.constant 7 : index
      %c0_13 = arith.constant 0 : index
      %23 = vector.load %arg5[%c7, %c0_13] : memref<16x128xf32, #tpu.memory_space<vmem>>, vector<1x128xf32>
      tpu.vector_store %arg5[%c7, %c0_13], %22 {strides = array<i32>} : memref<16x128xf32, #tpu.memory_space<vmem>>, vector<1x128xf32>,
      %24 = vector.extract_strided_slice %7 {offsets = [0, 8], sizes = [1, 128], strides = [1, 1]} : vector<1x143xf32> to vector<1x128xf32>
      %c8 = arith.constant 8 : index
      %c0_14 = arith.constant 0 : index
      %25 = vector.load %arg5[%c8, %c0_14] : memref<16x128xf32, #tpu.memory_space<vmem>>, vector<1x128xf32>
      tpu.vector_store %arg5[%c8, %c0_14], %24 {strides = array<i32>} : memref<16x128xf32, #tpu.memory_space<vmem>>, vector<1x128xf32>,
      %26 = vector.extract_strided_slice %7 {offsets = [0, 9], sizes = [1, 128], strides = [1, 1]} : vector<1x143xf32> to vector<1x128xf32>
      %c9 = arith.constant 9 : index
      %c0_15 = arith.constant 0 : index
      %27 = vector.load %arg5[%c9, %c0_15] : memref<16x128xf32, #tpu.memory_space<vmem>>, vector<1x128xf32>
      tpu.vector_store %arg5[%c9, %c0_15], %26 {strides = array<i32>} : memref<16x128xf32, #tpu.memory_space<vmem>>, vector<1x128xf32>,
      %28 = vector.extract_strided_slice %7 {offsets = [0, 10], sizes = [1, 128], strides = [1, 1]} : vector<1x143xf32> to vector<1x128xf32>
      %c10 = arith.constant 10 : index
      %c0_16 = arith.constant 0 : index
      %29 = vector.load %arg5[%c10, %c0_16] : memref<16x128xf32, #tpu.memory_space<vmem>>, vector<1x128xf32>
      tpu.vector_store %arg5[%c10, %c0_16], %28 {strides = array<i32>} : memref<16x128xf32, #tpu.memory_space<vmem>>, vector<1x128xf32>,
      %30 = vector.extract_strided_slice %7 {offsets = [0, 11], sizes = [1, 128], strides = [1, 1]} : vector<1x143xf32> to vector<1x128xf32>
      %c11 = arith.constant 11 : index
      %c0_17 = arith.constant 0 : index
      %31 = vector.load %arg5[%c11, %c0_17] : memref<16x128xf32, #tpu.memory_space<vmem>>, vector<1x128xf32>
      tpu.vector_store %arg5[%c11, %c0_17], %30 {strides = array<i32>} : memref<16x128xf32, #tpu.memory_space<vmem>>, vector<1x128xf32>,
      %32 = vector.extract_strided_slice %7 {offsets = [0, 12], sizes = [1, 128], strides = [1, 1]} : vector<1x143xf32> to vector<1x128xf32>
      %c12 = arith.constant 12 : index
      %c0_18 = arith.constant 0 : index
      %33 = vector.load %arg5[%c12, %c0_18] : memref<16x128xf32, #tpu.memory_space<vmem>>, vector<1x128xf32>
      tpu.vector_store %arg5[%c12, %c0_18], %32 {strides = array<i32>} : memref<16x128xf32, #tpu.memory_space<vmem>>, vector<1x128xf32>,
      %34 = vector.extract_strided_slice %7 {offsets = [0, 13], sizes = [1, 128], strides = [1, 1]} : vector<1x143xf32> to vector<1x128xf32>
      %c13 = arith.constant 13 : index
      %c0_19 = arith.constant 0 : index
      %35 = vector.load %arg5[%c13, %c0_19] : memref<16x128xf32, #tpu.memory_space<vmem>>, vector<1x128xf32>
      tpu.vector_store %arg5[%c13, %c0_19], %34 {strides = array<i32>} : memref<16x128xf32, #tpu.memory_space<vmem>>, vector<1x128xf32>,
      %36 = vector.extract_strided_slice %7 {offsets = [0, 14], sizes = [1, 128], strides = [1, 1]} : vector<1x143xf32> to vector<1x128xf32>
      %c14 = arith.constant 14 : index
      %c0_20 = arith.constant 0 : index
      %37 = vector.load %arg5[%c14, %c0_20] : memref<16x128xf32, #tpu.memory_space<vmem>>, vector<1x128xf32>
      tpu.vector_store %arg5[%c14, %c0_20], %36 {strides = array<i32>} : memref<16x128xf32, #tpu.memory_space<vmem>>, vector<1x128xf32>,
      %38 = vector.extract_strided_slice %7 {offsets = [0, 15], sizes = [1, 128], strides = [1, 1]} : vector<1x143xf32> to vector<1x128xf32>
      %c15 = arith.constant 15 : index
      %c0_21 = arith.constant 0 : index
      %39 = vector.load %arg5[%c15, %c0_21] : memref<16x128xf32, #tpu.memory_space<vmem>>, vector<1x128xf32>
      tpu.vector_store %arg5[%c15, %c0_21], %38 {strides = array<i32>} : memref<16x128xf32, #tpu.memory_space<vmem>>, vector<1x128xf32>,
      %c0_22 = arith.constant 0 : index
      %c0_23 = arith.constant 0 : index
      %40 = vector.load %arg5[%c0_22, %c0_23] : memref<16x128xf32, #tpu.memory_space<vmem>>, vector<16x128xf32>
      %cst = arith.constant dense<0.000000e+00> : vector<8x128xf32>
      %41 = tpu.matmul %0, %40, %cst {dimension_numbers = #tpu.dot_dimension_numbers<[1], [0], [0], [1], [0, 0, 1, 1], [], []>} : vector<8x16xf32>, vector<16x128xf32>, vector<8x128xf32> -> vector<8x128xf32>
      %c128_i32_24 = arith.constant 128 : i32
      %42 = arith.muli %arg6, %c128_i32_24 : i32
      %43 = arith.addi %42, %3 : i32
      %44 = tpu.assume_multiple %43, 128 : i32
      %c0_25 = arith.constant 0 : index
      %c0_26 = arith.constant 0 : index
      %45 = arith.index_cast %44 : i32 to index
      %46 = vector.load %arg4[%c0_25, %c0_26, %45] : memref<1x8x256xf32, #tpu.memory_space<vmem>>, vector<1x8x128xf32>
      %47 = vector.shape_cast %46 : vector<1x8x128xf32> to vector<8x128xf32>
      %48 = vector.shape_cast %41 : vector<8x128xf32> to vector<1x8x128xf32>
      tpu.vector_store %arg4[%c0_25, %c0_26, %45], %48 {strides = array<i32>} : memref<1x8x256xf32, #tpu.memory_space<vmem>>, vector<1x8x128xf32>,
      %c1_i32_27 = arith.constant 1 : i32
    }
    %c2_i32_1 = arith.constant 2 : i32
    return
  }
  func.func @transform_0(%arg0: i32, %arg1: i32) -> (i32, i32) {
    %c0_i32 = arith.constant 0 : i32
    %c0_i32_0 = arith.constant 0 : i32
    %c0_i32_1 = arith.constant 0 : i32
    return %c0_i32, %c0_i32_0 : i32, i32
  }
  func.func @transform_1(%arg0: i32, %arg1: i32) -> (i32, i32, i32, i32) {
    %c0_i32 = arith.constant 0 : i32
    %c0_i32_0 = arith.constant 0 : i32
    %c0_i32_1 = arith.constant 0 : i32
    return %arg0, %arg1, %c0_i32, %c0_i32_0 : i32, i32, i32, i32
  }
  func.func @transform_2(%arg0: i32, %arg1: i32) -> (i32, i32, i32) {
    %c0_i32 = arith.constant 0 : i32
    %c0_i32_0 = arith.constant 0 : i32
    return %arg0, %c0_i32, %arg1 : i32, i32, i32
  }
}

</mosaic_0001>

<bundles_post_ra>
// kernel: tpu_custom_call.1
= control target key start
LH: loop header
LB: loop body
LE: loop exit
PB: predicated region body
PF: predicated region fallthrough
CT: control target
= control target key end

     0   :  { %s1161_s0 = inlined_call_operand.hbm [shape: f32[8,16], index: 0, kind: input, shape index: {}]   ;;  %s1162_s1 = inlined_call_operand.hbm [shape: f32[2,4,2,256], index: 1, kind: input, shape index: {}]   ;;  %s1163_s2 = inlined_call_operand.hbm [shape: f32[2,8,1024], index: 2, kind: output, shape index: {}]  }
   0x1   :  { %1171 = sst [smem:[#allocation15_spill]] %s1161_s0 }
   0x2   :  { %7 = vsyncpa [#allocation4], 0 }
   0x3   :  { %8 = vsyncpa [#allocation7], 0 }
   0x4   :  { %10 = vsyncpa [#allocation7 + $0x1], 0 }
   0x5   :  { %11 = vsyncpa [#allocation5], 0 }
   0x6   :  { %13 = vsyncpa [#allocation5 + $0x1], 0  ;;  %s908_s9 = smov 0   ;;  %s910_s10 = smov 0  }
   0x7   :  { %s912_s11 = smov 0   ;;  %s914_s12 = smov 0  }
   0x8   :  { %s916_s13 = smov 0   ;;  %s918_s14 = smov 0  }
   0x9   :  { %s920_s15 = smov 0   ;;  %s922_s16 = smov 0  }
   0xa LB: > { %1172 = sst [smem:[#allocation12_spill]] %s858_s14  ;;  %s549_s17 = sadd.s32 4294967295, %s866_s16   ;;  %s866_s16 = sphi %s922_s16, %s19_s16   ;;  %s862_s15 = sphi %s920_s15, %s1197_s15   ;;  %s858_s14 = sphi %s918_s14, %s1191_s14   ;;  %s854_s13 = sphi %s916_s13, %s1196_s13   ;;  %s850_s12 = sphi %s914_s12, %s1190_s12   ;;  %s846_s11 = sphi %s912_s11, %s1195_s11   ;;  %s842_s10 = sphi %s910_s10, %s1194_s10   ;;  %s838_s9 = sphi %s908_s9, %s1193_s9  }
   0xb   : > { %s550_s18 = sadd.s32 4294967294, %s866_s16   ;;  %p74_p0 = scmp.ne.s32.totalorder %s842_s10, %s838_s9 }
   0xc   : > { %p952_p1 = scmp.eq.s32.totalorder %s549_s17, 0  ;;  %p956_p2 = scmp.eq.s32.totalorder %s549_s17, 7 }
   0xd   : > { %p106_p3 = scmp.eq.s32.totalorder %s550_s18, 7  ;;  %p551_p5 = scmp.ge.s32.totalorder %s866_s16, 1 }
   0xe   : > { %s1173_s19 = scalar_select %p952_p1, 1, 0 }
   0xf   : > { %s1174_s20 = scalar_select %p956_p2, 1, 0 }
  0x10   : > { %p962_p4 = por %p952_p1, %p74_p0  ;;  %p967_p6 = por %p106_p3, %p74_p0 }
  0x11   : > { %p113_p7 = scmp.lt.s32.totalorder %s866_s16, 9  ;;  %s872_s24 = smov [#allocation3]  }
  0x12   : > { %s1175_s21 = scalar_select %p962_p4, 1, 0 }
  0x13   : > { %s1176_s22 = scalar_select %p967_p6, 1, 0 }
  0x14   : > { %p972_p8 = pnand %p551_p5, %p113_p7  ;;  %s126_s25 = sshll.u32 %s872_s24, 4  ;;  %s127_s25 = int_to_ptr.vmem [resolvable:$true] %s126_s25 }
  0x15   : > { %s28_s27 = sadd.s32 1, %s858_s14  ;;  %s1179_s0 = sld [smem:[#allocation15_spill]] }
  0x16   : > { %s1177_s23 = scalar_select %p972_p8, 1, 0 }
  0x17   : > { %p595_p9 = pneg %p972_p8 }
  0x19   : > { %p980_p10 = pnand %p595_p9, %p952_p1 }
  0x1b   : > { %s702_s30 = scalar_lea.hbm %s1179_s0, 128  ;;  %p704_p12 = pneg %p980_p10 }
  0x1c   : > { %p703_p11 = scmp.ne.s32.totalorder %s1179_s0, %s702_s30  ;;  %p709_p3 = scmp.lt.u32.totalorder %s702_s30, %s1179_s0 }
  0x1e   : > { %p705_p13 = pnand %p704_p12, %p703_p11 }
  0x20   : > { %p706_p0 = pneg %p705_p13 }
  0x22   : > { %p711_p5 = pnand %p709_p3, %p706_p0 }
  0x24   : > { %714 = shalt.err (!%p711_p5)
}
  0x25   : > { %s715_s7 = scalar_lea.vmem %s127_s25, 128  ;;  %p723_p4 = scmp.lt.s32.totalorder %s127_s25, %s127_s25 }
  0x26   : > { %p716_p7 = scmp.ne.s32.totalorder %s127_s25, %s715_s7  ;;  %p724_p1 = scmp.lt.s32.totalorder %s715_s7, %s715_s7 }
  0x28   : > { %p718_p9 = pnand %p716_p7, %p704_p12  ;;  %p725_p8 = por %p724_p1, %p723_p4 }
  0x2a   : > { %p719_p6 = pneg %p718_p9 }
  0x2c   : > { %p726_p2 = pnand %p725_p8, %p719_p6 }
  0x2e   : > { %729 = shalt.err (!%p726_p2)
}
  0x2f   : > { %598 = dma.hbm_to_vmem [thread:$0]  (!%p980_p10), %s1179_s0, 128, %s127_s25, [#allocation4]  }
  0x30   : > { %p29_p1 = scmp.ge.s32.totalorder %s28_s27, 4  ;;  %s31_s18 = sadd.s32 1, %s862_s15 }
  0x31   : > { %s61_s24 = sadd.s32 1, %s846_s11  ;;  %p68_p2 = scmp.ne.s32.totalorder %s846_s11, %s842_s10 }
  0x32   : > { %s1199_s27 = smov (%p29_p1, %s28_s27), 0  ;;  %s1201_s18 = smov (!%p29_p1, %s31_s18), %s862_s15 }
  0x33   : > { %1180 = sst [smem:[#allocation13_spill]] %s1199_s27  ;;  %s57_s26 = ssub.s32 %s858_s14, %s1199_s27 }
  0x34   : > { %p69_p4 = scmp.eq.s32.totalorder %s866_s16, 0  ;;  %p33_p6 = scmp.ge.s32.totalorder %s1201_s18, 2 }
  0x35   : > { %p1181_p8 = scmp.ne.s32.totalorder %s1174_s20, 0  ;;  %p608_p12 = scmp.lt.s32.totalorder %s866_s16, 8 }
  0x36   : > { %p1017_p10 = por %p69_p4, %p68_p2  ;;  %s1203_s18 = smov (%p33_p6, %s1201_s18), 0 }
  0x37   : > { %p1013_p11 = por %p1181_p8, %p68_p2  ;;  %1184 = sst [smem:[#allocation14_spill]] %s1203_s18 }
  0x38   : > { %s137_s29 = sand.u32 1, %s846_s11   ;;  %s555_s30 = sshll.u32 %s858_s14, 1 }
  0x39   : > { %s56_s3 = ssub.s32 %s862_s15, %s1203_s18  ;;  %s554_s5 = sshll.u32 %s137_s29, 2 }
  0x3a   : > { %s58_s4 = sor.u32 %s57_s26, %s56_s3  ;;  %s556_s20 = sshll.u32 %s862_s15, 3 }
  0x3b   : > { %p59_p13 = scmp.eq.s32.totalorder %s58_s4, 0  ;;  %s141_s6 = scalar_lea.vmem [#allocation6], %s554_s5 }
  0x3c   : > { %s151_s7 = sshll.u32 %s141_s6, 4  ;;  %s147_s17 = sadd.s32 %s556_s20, %s555_s30  ;;  %s1032_s7 = int_to_ptr.vmem [resolvable:$true] %s151_s7 }
  0x3d   : > { %s1030_s8 = scalar_select %p59_p13, %s846_s11, %s61_s24  }
  0x3e   : > { %s557_s0 = sshll.u32 %s147_s17, 5  ;;  %p1038_p0 = pnand %p608_p12, %p1017_p10 }
  0x3f   : > { %s1045_s26 = scalar_lea.hbm %s1162_s1, %s557_s0  ;;  %s138_s24 = scalar_lea.sflag [#allocation7], %s137_s29 }
  0x40   : > { %s730_s30 = scalar_lea.hbm %s1045_s26, 64  ;;  %p732_p5 = pneg %p1038_p0 }
  0x41   : > { %p731_p3 = scmp.ne.s32.totalorder %s1045_s26, %s730_s30  ;;  %s735_s14 = scalar_lea.hbm %s1162_s1, 512 }
  0x42   : > { %p736_p1 = scmp.lt.u32.totalorder %s1045_s26, %s1162_s1  ;;  %p737_p2 = scmp.lt.u32.totalorder %s735_s14, %s730_s30 }
  0x43   : > { %p733_p7 = pnand %p732_p5, %p731_p3  ;;  %p739_p6 = scmp.lt.u32.totalorder %s730_s30, %s1045_s26 }
  0x44   : > { %p738_p4 = por %p737_p2, %p736_p1 }
  0x45   : > { %p734_p9 = pneg %p733_p7 }
  0x46   : > { %p740_p8 = por %p739_p6, %p738_p4 }
  0x48   : > { %p741_p10 = pnand %p740_p8, %p734_p9 }
  0x4a   : > { %744 = shalt.err (!%p741_p10)
}
  0x4b   : > { %s745_s29 = scalar_lea.vmem %s1032_s7, 64  ;;  %s873_s4 = smov [#allocation6]  }
  0x4c   : > { %p746_p12 = scmp.ne.s32.totalorder %s1032_s7, %s745_s29  ;;  %s750_s5 = sshll.u32 %s873_s4, 4  ;;  %s751_s5 = int_to_ptr.vmem [resolvable:$false] %s750_s5 }
  0x4d   : > { %s752_s20 = scalar_lea.vmem %s751_s5, 128  ;;  %p753_p7 = scmp.lt.s32.totalorder %s1032_s7, %s751_s5 }
  0x4e   : > { %p748_p13 = pnand %p746_p12, %p732_p5  ;;  %p754_p1 = scmp.lt.s32.totalorder %s752_s20, %s745_s29 }
  0x50   : > { %p749_p3 = pneg %p748_p13  ;;  %p755_p2 = por %p754_p1, %p753_p7 }
  0x52   : > { %p756_p4 = pnand %p755_p2, %p749_p3 }
  0x54   : > { %759 = shalt.err (!%p756_p4)
}
  0x55   : > { %602 = dma.hbm_to_vmem [thread:$0]  (!%p1038_p0), %s1045_s26, 64, %s1032_s7, %s138_s24  }
  0x56   : > { %p1186_p9 = scmp.ne.s32.totalorder %s1177_s23, 0 }
  0x57   : > { %p1187_p5 = scmp.ne.s32.totalorder (!%p1186_p9), %s1173_s19, 0 }
  0x58   : > { %160 = sbr.rel (%p1186_p9) target bundleno = 521 (0x209), region = 28 }
  0x5f   : > { %825 = dma.done.wait (%p1187_p5), [#allocation4], 128  }
  0x60   : > { %827 = vsyncadd (%p1187_p5), [#allocation4], 4294967168  ;;  %s1079_s6 = sand.u32 1, %s842_s10   ;;  %p1188_p0 = scmp.ne.s32.totalorder %s1175_s21, 0 }
  0x61   : > { %s560_s17 = sshll.u32 %s1079_s6, 2  ;;  %s167_s27 = scalar_lea.sflag [#allocation7], %s1079_s6 }
  0x62   : > { %s1083_s30 = scalar_lea.vmem [#allocation6], %s560_s17 }
  0x63   : > { %829 = dma.done.wait (%p1188_p0), %s167_s27, 64  }
  0x64   : > { %831 = vsyncadd (%p1188_p0), %s167_s27, 4294967232  ;;  %s561_s23 = sshll.u32 %s1079_s6, 4  ;;  %v1090_v0 = vld [vmem:[#allocation3] sm:$0xff]  ;;  %s1094_s7 = smov 0  }
  0x65   : > { %s1092_s19 = scalar_lea.vmem [#allocation8], %s561_s23 }
  0x66 LB: >> { %v211_v1 = vlaneseq  ;;  %s199_s26 = sshra.s32 %s870_s7, 1  ;;  %s202_s21 = sand.u32 1, %s870_s7  ;;  %v886_v8 = vmov 0.0|0.0   ;;  %vm889_vm0 = vmmov 0   ;;  %v890_v9 = vmov 0.0   ;;  %s870_s7 = sphi %s1094_s7, %s198_s7  }
  0x67   : >> { %s573_s24 = sshll.u32 %s199_s26, 2  ;;  %s874_s14 = smov 126   ;;  %584 = vmatprep.subr.bf16.mxu0 %v886_v8  ;;  %581 = vmatprep.mubr.msk.f32.mxu0 %vm889_vm0, %v890_v9  ;;  %vm231_vm1 = vcmask 1031168   ;;  %vm223_vm2 = vcmask 1039360   ;;  %vm239_vm3 = vcmask 1022976   ;;  %vm247_vm4 = vcmask 1014784  }
  0x68   : >> { %v212_v2 = vshrl.u32 %v211_v1, 7  ;;  %s206_s25 = sadd.s32 %s573_s24, %s202_s21  ;;  %s875_s18 = smov 127   ;;  %vm255_vm5 = vcmask 1006592   ;;  %vm263_vm6 = vcmask 998400   ;;  %vm271_vm7 = vcmask 990208  }
  0x69   : >> { %s207_s3 = scalar_lea.vmem %s1083_s30, %s206_s25 [#allocation6]  ;;  %s876_s0 = smov 125   ;;  %vm279_vm8 = vcmask 982016   ;;  %vm287_vm9 = vcmask 973824   ;;  %vm295_vm10 = vcmask 965632   ;;  %vm303_vm11 = vcmask 957440  }
  0x6a   : >> { %v213_v3 = vsub.s32 0, %v212_v2  ;;  %v217_v4 = vsub.s32 1, %v212_v2  ;;  %v208_v5 = vld [vmem:[%s207_s3] ss:$2 sm:$0x3]  ;;  %s877_s29 = smov 124  }
  0x6b   : >> { %209 = vst [vmem:[#allocation2] sm:$0x1] %v208_v5  ;;  %s878_s4 = smov 123   ;;  %s879_s5 = smov 122   ;;  %vm311_vm12 = vcmask 949248   ;;  %vm319_vm13 = vcmask 941056  }
  0x6c   : >> { %v214_v6 = vrot.slane %v208_v5, %v213_v3  ;;  %v218_v7 = vrot.slane %v208_v5, %v217_v4  ;;  %s880_s20 = smov 121   ;;  %s881_s17 = smov 120   ;;  %vm327_vm14 = vcmask 932864   ;;  %vm335_vm15 = vcmask 924672  }
  0x6d   : >> { %s882_s27 = smov 119   ;;  %s883_s23 = smov 118   ;;  %vm341_vm0 = vcmask 130048  }
  0x6e   : >> { %227 = vrot.lane.b32.xlu1 %v214_v6, %s874_s14  ;;  %219 = vrot.lane.b32.xlu0 %v214_v6, %s875_s18  ;;  %s884_s26 = smov 117   ;;  %s885_s21 = smov 116  }
  0x6f   : >> { %s887_s24 = smov 115   ;;  %s888_s25 = smov 114  }
  0x70   : >> { %s891_s3 = smov 113  }
  0x72   : >> { %229 = vrot.lane.b32.xlu1 %v218_v7, %s874_s14  ;;  %221 = vrot.lane.b32.xlu0 %v218_v7, %s875_s18  ;;  %s565_s14 = sshll.u32 %s870_s7, 7  ;;  %s198_s7 = sadd.s32 1, %s870_s7  }
  0x73   : >> { %s417_s18 = sshra.s32 %s565_s14, 7  ;;  %p195_p6 = scmp.ge.s32.totalorder %s198_s7, 2  }
  0x76   : >> { %237 = vrot.lane.b32.xlu1 %v218_v7, %s876_s0  ;;  %235 = vrot.lane.b32.xlu0 %v214_v6, %s876_s0  ;;  %s566_s0 = sshll.u32 %s417_s18, 3 }
  0x7a   : >> { %245 = vrot.lane.b32.xlu1 %v218_v7, %s877_s29  ;;  %243 = vrot.lane.b32.xlu0 %v214_v6, %s877_s29  ;;  %s420_s29 = scalar_lea.vmem %s1092_s19, %s566_s0 [#allocation8] }
  0x7e   : >> { %253 = vrot.lane.b32.xlu1 %v218_v7, %s878_s4  ;;  %251 = vrot.lane.b32.xlu0 %v214_v6, %s878_s4  ;;  %s568_s4 = sshll.u32 (%p195_p6), %s850_s12, 1  ;;  %s892_s12 = smov (%p195_p6), [#allocation8]  }
  0x82   : >> { %261 = vrot.lane.b32.xlu1 %v218_v7, %s879_s5  ;;  %259 = vrot.lane.b32.xlu0 %v214_v6, %s879_s5  ;;  %s569_s5 = sshll.u32 (%p195_p6), %s854_s13, 3  ;;  %s764_s13 = sshll.u32 (%p195_p6), %s892_s12, 4  ;;  %s765_s13 = int_to_ptr.vmem [resolvable:$false] %s764_s13 }
  0x86   : >> { %269 = vrot.lane.b32.xlu1 %v218_v7, %s880_s20  ;;  %267 = vrot.lane.b32.xlu0 %v214_v6, %s880_s20  ;;  %s439_s20 = sshll.u32 (%p195_p6), %s1092_s19, 4  ;;  %s766_s19 = scalar_lea.vmem (%p195_p6), %s765_s13, 512  ;;  %s1111_s20 = int_to_ptr.vmem [resolvable:$true] %s439_s20 }
  0x87   : > { %s760_s30 = scalar_lea.vmem (%p195_p6), %s1111_s20, 256  ;;  %p767_p13 = scmp.lt.s32.totalorder (%p195_p6), %s1111_s20, %s765_s13 }
  0x88   : > { %p761_p8 = scmp.ne.s32.totalorder (%p195_p6), %s1111_s20, %s760_s30  ;;  %p768_p3 = scmp.lt.s32.totalorder (%p195_p6), %s766_s19, %s760_s30 }
  0x8a   : >> { %277 = vrot.lane.b32.xlu1 %v218_v7, %s881_s17  ;;  %275 = vrot.lane.b32.xlu0 %v214_v6, %s881_s17  ;;  %s435_s17 = sadd.s32 (%p195_p6), %s569_s5, %s568_s4  ;;  %p762_p10 = pnand (%p195_p6), %p761_p8, %p1013_p11 }
  0x8b   : > { %p769_p7 = por (%p195_p6), %p768_p3, %p767_p13 }
  0x8c   : > { %p763_p12 = pneg (%p195_p6), %p762_p10 }
  0x8e   : >> { %285 = vrot.lane.b32.xlu1 %v218_v7, %s882_s27  ;;  %283 = vrot.lane.b32.xlu0 %v214_v6, %s882_s27  ;;  %s570_s27 = sshll.u32 (%p195_p6), %s435_s17, 7  ;;  %p770_p1 = pnand (%p195_p6), %p769_p7, %p763_p12 }
  0x8f   : > { %s437_s7 = scalar_lea.hbm (%p195_p6), %s1163_s2, %s570_s27 }
  0x92   : >> { %293 = vrot.lane.b32.xlu1 %v218_v7, %s883_s23  ;;  %291 = vrot.lane.b32.xlu0 %v214_v6, %s883_s23 }
  0x96   : >> { %301 = vrot.lane.b32.xlu1 %v218_v7, %s884_s26  ;;  %299 = vrot.lane.b32.xlu0 %v214_v6, %s884_s26 }
  0x9a   : >> { %309 = vrot.lane.b32.xlu1 %v218_v7, %s885_s21  ;;  %307 = vrot.lane.b32.xlu0 %v214_v6, %s885_s21  ;;  %s423_s21 = scalar_lea.sflag (%p195_p6), [#allocation5], %s1079_s6 }
  0x9e   : >> { %317 = vrot.lane.b32.xlu1 %v218_v7, %s887_s24  ;;  %315 = vrot.lane.b32.xlu0 %v214_v6, %s887_s24 }
  0xa2   : >> { %325 = vrot.lane.b32.xlu1 %v218_v7, %s888_s25  ;;  %323 = vrot.lane.b32.xlu0 %v214_v6, %s888_s25 }
  0xa6   : >> { %333 = vrot.lane.b32.xlu1 %v218_v7, %s891_s3  ;;  %331 = vrot.lane.b32.xlu0 %v214_v6, %s891_s3 }
  0xe0   : >> { %v228_v10 = vpop.permute.xlu1 %227  ;;  %v220_v11 = vpop.permute.xlu0 %219 }
  0xe4   : >> { %v230_v12 = vpop.permute.xlu1 %229  ;;  %v222_v13 = vpop.permute.xlu0 %221 }
  0xe5   : >> { %v232_v14 = vsel %vm231_vm1, %v228_v10, %v230_v12  ;;  %v224_v15 = vsel %vm223_vm2, %v220_v11, %v222_v13 }
  0xe6   : >> { %234 = vst [vmem:[#allocation2 + $0x2] sm:$0x1] %v232_v14  ;;  %226 = vst [vmem:[#allocation2 + $0x1] sm:$0x1] %v224_v15 }
  0xe8   : >> { %v238_v16 = vpop.permute.xlu1 %237  ;;  %v236_v17 = vpop.permute.xlu0 %235 }
  0xe9   : >> { %v240_v18 = vsel %vm239_vm3, %v236_v17, %v238_v16 }
  0xea   : >> { %242 = vst [vmem:[#allocation2 + $0x3] sm:$0x1] %v240_v18 }
  0xec   : >> { %v246_v19 = vpop.permute.xlu1 %245  ;;  %v244_v20 = vpop.permute.xlu0 %243 }
  0xed   : >> { %v248_v21 = vsel %vm247_vm4, %v244_v20, %v246_v19 }
  0xee   : >> { %250 = vst [vmem:[#allocation2 + $0x4] sm:$0x1] %v248_v21 }
  0xf0   : >> { %v254_v22 = vpop.permute.xlu1 %253  ;;  %v252_v23 = vpop.permute.xlu0 %251 }
  0xf1   : >> { %v256_v24 = vsel %vm255_vm5, %v252_v23, %v254_v22 }
  0xf2   : >> { %258 = vst [vmem:[#allocation2 + $0x5] sm:$0x1] %v256_v24 }
  0xf4   : >> { %v262_v25 = vpop.permute.xlu1 %261  ;;  %v260_v26 = vpop.permute.xlu0 %259 }
  0xf5   : >> { %v264_v27 = vsel %vm263_vm6, %v260_v26, %v262_v25 }
  0xf6   : >> { %266 = vst [vmem:[#allocation2 + $0x6] sm:$0x1] %v264_v27 }
  0xf8   : >> { %v270_v28 = vpop.permute.xlu1 %269  ;;  %v268_v29 = vpop.permute.xlu0 %267 }
  0xf9   : >> { %v272_v30 = vsel %vm271_vm7, %v268_v29, %v270_v28 }
  0xfa   : >> { %274 = vst [vmem:[#allocation2 + $0x7] sm:$0x1] %v272_v30 }
  0xfc   : >> { %v278_v31 = vpop.permute.xlu1 %277  ;;  %v276_v32 = vpop.permute.xlu0 %275 }
  0xfd   : >> { %v280_v33 = vsel %vm279_vm8, %v276_v32, %v278_v31 }
  0xfe   : >> { %282 = vst [vmem:[#allocation2 + $0x8] sm:$0x1] %v280_v33 }
 0x100   : >> { %v286_v34 = vpop.permute.xlu1 %285  ;;  %v284_v35 = vpop.permute.xlu0 %283 }
 0x101   : >> { %v288_v36 = vsel %vm287_vm9, %v284_v35, %v286_v34  ;;  %v339_v55 = vld [vmem:[#allocation2] sm:$0xff] }
 0x102   : >> { %290 = vst [vmem:[#allocation2 + $0x9] sm:$0x1] %v288_v36 }
 0x104   : >> { %v294_v37 = vpop.permute.xlu1 %293  ;;  %v292_v38 = vpop.permute.xlu0 %291 }
 0x105   : >> { %v296_v39 = vsel %vm295_vm10, %v292_v38, %v294_v37 }
 0x106   : >> { %298 = vst [vmem:[#allocation2 + $0xa] sm:$0x1] %v296_v39 }
 0x108   : >> { %v302_v40 = vpop.permute.xlu1 %301  ;;  %v300_v41 = vpop.permute.xlu0 %299 }
 0x109   : >> { %v304_v42 = vsel %vm303_vm11, %v300_v41, %v302_v40 }
 0x10a   : >> { %306 = vst [vmem:[#allocation2 + $0xb] sm:$0x1] %v304_v42 }
 0x10c   : >> { %v310_v43 = vpop.permute.xlu1 %309  ;;  %v308_v44 = vpop.permute.xlu0 %307 }
 0x10d   : >> { %v312_v45 = vsel %vm311_vm12, %v308_v44, %v310_v43 }
 0x10e   : >> { %314 = vst [vmem:[#allocation2 + $0xc] sm:$0x1] %v312_v45 }
 0x110   : >> { %v318_v46 = vpop.permute.xlu1 %317  ;;  %v316_v47 = vpop.permute.xlu0 %315 }
 0x111   : >> { %v320_v48 = vsel %vm319_vm13, %v316_v47, %v318_v46 }
 0x112   : >> { %322 = vst [vmem:[#allocation2 + $0xd] sm:$0x1] %v320_v48 }
 0x114   : >> { %v326_v49 = vpop.permute.xlu1 %325  ;;  %v324_v50 = vpop.permute.xlu0 %323 }
 0x115   : >> { %v328_v51 = vsel %vm327_vm14, %v324_v50, %v326_v49 }
 0x116   : >> { %330 = vst [vmem:[#allocation2 + $0xe] sm:$0x1] %v328_v51 }
 0x118   : >> { %v334_v52 = vpop.permute.xlu1 %333  ;;  %v332_v53 = vpop.permute.xlu0 %331 }
 0x119   : >> { %v336_v54 = vsel %vm335_vm15, %v332_v53, %v334_v52 }
 0x11a   : >> { %338 = vst [vmem:[#allocation2 + $0xf] sm:$0x1] %v336_v54 }
 0x121   : >> { %v340_v56 = vld [vmem:[#allocation2 + $0x8] sm:$0xff] }
 0x122   : >> { %v585_v57 = vpack.c.bf16 %v340_v56, %v339_v55 }
 0x124   : >> { %586 = vmatpush3.bf16.msra.mxu0 %v585_v57 }
 0x127   : >> { %582 = vmatmul.mubr.msk.f32.vlgmr.msra.gmra.mrb[0].mxu0 %vm341_vm0, %v1090_v0 }
 0x1f5   : > { %197 = sbr.rel (!%p195_p6) target bundleno = 102 (0x66), region = 87 }
 0x1fa   : >> { %v411_v58 = vpop.f32.mrb[0].mxu0 }
 0x1fb   : >> { %421 = vst [vmem:[%s420_s29] sm:$0xff] %v411_v58  ;;  %v583_v59 = vpop.f32.mrb[1].mxu0 }
 0x1fc   : > { %773 = shalt.err (!%p770_p1)
}
 0x1fd   : > { %s774_s24 = scalar_lea.hbm %s437_s7, 256  ;;  %s778_s3 = scalar_lea.hbm %s1163_s2, 2048 }
 0x1fe   : > { %p775_p2 = scmp.ne.s32.totalorder %s437_s7, %s774_s24  ;;  %p779_p5 = scmp.lt.u32.totalorder %s437_s7, %s1163_s2 }
 0x1ff   : > { %p780_p0 = scmp.lt.u32.totalorder %s778_s3, %s774_s24  ;;  %p782_p8 = scmp.lt.u32.totalorder %s774_s24, %s437_s7 }
 0x200   : > { %p776_p4 = pnand %p775_p2, %p1013_p11 }
 0x201   : > { %p781_p6 = por %p780_p0, %p779_p5 }
 0x202   : > { %p777_p9 = pneg %p776_p4 }
 0x203   : > { %p783_p10 = por %p782_p8, %p781_p6 }
 0x205   : > { %p784_p12 = pnand %p783_p10, %p777_p9 }
 0x207   : > { %787 = shalt.err (!%p784_p12)
}
 0x208   : > { %593 = dma.vmem_to_hbm [thread:$0]  (%p1013_p11), %s1111_s20, 256, %s437_s7, %s423_s21  }
 0x209 PF: > { %p610_p13 = scmp.ge.s32.totalorder %s866_s16, 2  ;;  %s451_s0 = sand.u32 1, %s838_s9  }
 0x20a   : > { %p1189_p3 = scmp.ne.s32.totalorder %s1176_s22, 0  ;;  %s452_s29 = scalar_lea.sflag [#allocation5], %s451_s0 }
 0x20c   : > { %p604_p7 = pnand %p610_p13, %p1189_p3 }
 0x20e   : > { %833 = dma.done.wait (!%p604_p7), %s452_s29, 256  }
 0x20f   : > { %835 = vsyncadd (!%p604_p7), %s452_s29, 4294967040  ;;  %s19_s16 = sadd.s32 1, %s866_s16   ;;  %s1190_s12 = sld [smem:[#allocation12_spill]] }
 0x210   : > { %p16_p1 = scmp.ge.s32.totalorder %s19_s16, 10   ;;  %s1191_s14 = sld [smem:[#allocation13_spill]] }
 0x211   : > { %s1192_s28 = sld [smem:[#allocation14_spill]]  ;;  %s1193_s9 = smov %s842_s10 }
 0x212   : > { %s1194_s10 = smov %s846_s11  ;;  %s1195_s11 = smov %s1030_s8 }
 0x213   : > { %s1196_s13 = smov %s862_s15  ;;  %18 = sbr.rel (!%p16_p1) target bundleno = 10 (0xa), region = 98 }
 0x217   : > { %s1197_s15 = smov %s1192_s28 }
 0x21a   :  { %457 = vsyncpa [#allocation4], 1 }
 0x21b   :  { %459 = vsyncpa [#allocation4 + $0x1], 1 }
 0x21c   :  { %460 = vsyncpa [#allocation7], 1 }
 0x21d   :  { %462 = vsyncpa [#allocation7 + $0x1], 1 }
 0x21e   :  { %463 = vsyncpa [#allocation5], 1 }
 0x21f   :  { %465 = vsyncpa [#allocation5 + $0x1], 1 }

</bundles_post_ra>
